<compile_context>
chip_gen: v7x
topology: tpu7x:2x2x1
jax: 0.10.0
libtpu: 0.0.40
codegen_flags: <defaults>
</compile_context>

<pallas_src>
import functools

import jax
import jax.numpy as jnp
from jax import lax
from jax.experimental import pallas as pl
from jax.experimental.pallas import tpu as pltpu


def _round_up(x, m):
    return ((x + m - 1) // m) * m


# ---------------------------------------------------------------------------
# LayerNorm over the whole (S, dmodel) slab per batch element (eps = 1e-5)
# ---------------------------------------------------------------------------
def _layernorm_kernel(x_ref, o_ref):
    x = x_ref[...].astype(jnp.float32)
    mu = jnp.mean(x, axis=(0, 1), keepdims=True)
    xc = x - mu
    var = jnp.mean(xc * xc, axis=(0, 1), keepdims=True)
    o_ref[...] = (xc * lax.rsqrt(var + 1e-5)).astype(o_ref.dtype)


def layernorm(x):
    B, S, D = x.shape
    return pl.pallas_call(
        _layernorm_kernel,
        out_shape=jax.ShapeDtypeStruct((B, S, D), jnp.float32),
        grid_spec=pltpu.PrefetchScalarGridSpec(
            num_scalar_prefetch=0,
            grid=(B,),
            in_specs=[pl.BlockSpec((None, S, D), lambda b: (b, 0, 0))],
            out_specs=pl.BlockSpec((None, S, D), lambda b: (b, 0, 0)),
        ),
        compiler_params=pltpu.CompilerParams(dimension_semantics=("parallel",)),
    )(x)


# ---------------------------------------------------------------------------
# Linear: out = x @ W (+ b), bf16 MXU operands, f32 accumulate, resident weight
# ---------------------------------------------------------------------------
def _linear_kernel(x_ref, w_ref, b_ref, o_ref):
    acc = jnp.dot(x_ref[...], w_ref[...], preferred_element_type=jnp.float32)
    o_ref[...] = (acc + b_ref[...]).astype(o_ref.dtype)


def linear(x2d, w, b=None, *, tm=256):
    M, K = x2d.shape
    N = w.shape[1]
    tm_eff = min(tm, _round_up(M, 16))        # bf16 sublane packing -> multiple of 16
    Mp = _round_up(M, tm_eff)
    xb = x2d.astype(jnp.bfloat16)
    if Mp != M:
        xb = jnp.pad(xb, ((0, Mp - M), (0, 0)))
    wb = w.astype(jnp.bfloat16)
    b2d = (jnp.zeros((1, N), jnp.float32) if b is None
           else b.reshape(1, N).astype(jnp.float32))
    out = pl.pallas_call(
        _linear_kernel,
        out_shape=jax.ShapeDtypeStruct((Mp, N), jnp.float32),
        grid_spec=pltpu.PrefetchScalarGridSpec(
            num_scalar_prefetch=0,
            grid=(Mp // tm_eff,),
            in_specs=[
                pl.BlockSpec((tm_eff, K), lambda i: (i, 0)),
                pl.BlockSpec((K, N), lambda i: (0, 0)),      # resident weight
                pl.BlockSpec((1, N), lambda i: (0, 0)),
            ],
            out_specs=pl.BlockSpec((tm_eff, N), lambda i: (i, 0)),
        ),
        compiler_params=pltpu.CompilerParams(dimension_semantics=("parallel",)),
    )(xb, wb, b2d)
    return out[:M]


# ---------------------------------------------------------------------------
# FeedForward: relu(x @ w1 + b1) @ w2 + b2, dff tiled as a reduction axis
# ---------------------------------------------------------------------------
def _ffn_kernel(x_ref, w1_ref, b1_ref, w2_ref, b2_ref, o_ref, acc_ref):
    k = pl.program_id(1)

    @pl.when(k == 0)
    def _():
        acc_ref[...] = jnp.zeros_like(acc_ref)

    h = jnp.dot(x_ref[...], w1_ref[...], preferred_element_type=jnp.float32)
    h = jnp.maximum(h + b1_ref[...], 0.0)                       # b1 per dff-chunk, pre-ReLU
    acc_ref[...] += jnp.dot(h.astype(jnp.bfloat16), w2_ref[...],
                            preferred_element_type=jnp.float32)

    @pl.when(k == pl.num_programs(1) - 1)
    def _():
        o_ref[...] = (acc_ref[...] + b2_ref[...]).astype(o_ref.dtype)   # b2 only once

    del k


def feed_forward(x, w1, b1, w2, b2, *, tm=256, tf=512):
    B, S, dmodel = x.shape
    dff = w1.shape[1]
    M = B * S
    tm_eff = min(tm, _round_up(M, 16))
    Mp = _round_up(M, tm_eff)
    tf_eff = min(tf, dff)
    assert dff % tf_eff == 0 and (tf_eff % 128 == 0 or tf_eff == dff)

    xb = x.reshape(M, dmodel).astype(jnp.bfloat16)
    if Mp != M:
        xb = jnp.pad(xb, ((0, Mp - M), (0, 0)))

    out = pl.pallas_call(
        _ffn_kernel,
        out_shape=jax.ShapeDtypeStruct((Mp, dmodel), jnp.float32),
        grid_spec=pltpu.PrefetchScalarGridSpec(
            num_scalar_prefetch=0,
            grid=(Mp // tm_eff, dff // tf_eff),
            in_specs=[
                pl.BlockSpec((tm_eff, dmodel), lambda i, k: (i, 0)),
                pl.BlockSpec((dmodel, tf_eff), lambda i, k: (0, k)),
                pl.BlockSpec((1, tf_eff), lambda i, k: (0, k)),
                pl.BlockSpec((tf_eff, dmodel), lambda i, k: (k, 0)),
                pl.BlockSpec((1, dmodel), lambda i, k: (0, 0)),
            ],
            out_specs=pl.BlockSpec((tm_eff, dmodel), lambda i, k: (i, 0)),
            scratch_shapes=[pltpu.VMEM((tm_eff, dmodel), jnp.float32)],
        ),
        compiler_params=pltpu.CompilerParams(
            dimension_semantics=("parallel", "arbitrary"),
            vmem_limit_bytes=48 * 1024 * 1024,
        ),
    )(xb,
      w1.astype(jnp.bfloat16), b1.reshape(1, dff).astype(jnp.float32),
      w2.astype(jnp.bfloat16), b2.reshape(1, dmodel).astype(jnp.float32))
    return out[:M].reshape(B, S, dmodel)


# ---------------------------------------------------------------------------
# Attention core: softmax(Q K^T / sqrt(dk) [+ causal mask]) V, per (batch, head)
# ---------------------------------------------------------------------------
def _attn_kernel(q_ref, k_ref, v_ref, o_ref, *, scale, causal):
    q = q_ref[...].astype(jnp.bfloat16)
    k = k_ref[...].astype(jnp.bfloat16)
    s = lax.dot_general(q, k, (((1,), (1,)), ((), ())),
                        preferred_element_type=jnp.float32) * scale
    if causal:
        S = s.shape[0]
        row = lax.broadcasted_iota(jnp.int32, (S, S), 0)
        col = lax.broadcasted_iota(jnp.int32, (S, S), 1)
        s = jnp.where(col > row, jnp.float32(-1e30), s)
    s = s - jnp.max(s, axis=-1, keepdims=True)
    p = jnp.exp(s)
    p = p / jnp.sum(p, axis=-1, keepdims=True)
    v = v_ref[...].astype(jnp.bfloat16)
    o_ref[...] = jnp.dot(p.astype(jnp.bfloat16), v,
                         preferred_element_type=jnp.float32).astype(o_ref.dtype)


def attention_core(q4, k4, v4, *, causal):
    B, H, S, dk = q4.shape
    dv = v4.shape[-1]
    kern = functools.partial(_attn_kernel, scale=1.0 / (dk ** 0.5), causal=causal)
    return pl.pallas_call(
        kern,
        out_shape=jax.ShapeDtypeStruct((B, H, S, dv), jnp.float32),
        grid_spec=pltpu.PrefetchScalarGridSpec(
            num_scalar_prefetch=0,
            grid=(B, H),
            in_specs=[
                pl.BlockSpec((None, None, S, dk), lambda b, h: (b, h, 0, 0)),
                pl.BlockSpec((None, None, S, dk), lambda b, h: (b, h, 0, 0)),
                pl.BlockSpec((None, None, S, dv), lambda b, h: (b, h, 0, 0)),
            ],
            out_specs=pl.BlockSpec((None, None, S, dv), lambda b, h: (b, h, 0, 0)),
        ),
        compiler_params=pltpu.CompilerParams(
            dimension_semantics=("parallel", "parallel")),
    )(q4, k4, v4)


# ---------------------------------------------------------------------------
# Module-level composition (MHA, DecoderBlock, Decoder)
# ---------------------------------------------------------------------------
def multi_head_attention(q_in, k_in, v_in, wq, wk, wv, wo, *, h, dk, dv, causal):
    B, S, dmodel = q_in.shape
    q_all = linear(q_in.reshape(B * S, dmodel), wq)
    k_all = linear(k_in.reshape(B * S, dmodel), wk)
    v_all = linear(v_in.reshape(B * S, dmodel), wv)
    q4 = q_all.reshape(B, S, h, dk).transpose(0, 2, 1, 3)
    k4 = k_all.reshape(B, S, h, dk).transpose(0, 2, 1, 3)
    v4 = v_all.reshape(B, S, h, dv).transpose(0, 2, 1, 3)
    attn = attention_core(q4, k4, v4, causal=causal)
    concat = attn.transpose(0, 2, 1, 3).reshape(B * S, h * dv)
    return linear(concat, wo).reshape(B, S, dmodel)


def decoder_block(x_enc, x_dec, p, *, h, dk, dv):
    xd_n = layernorm(x_dec)
    a1 = multi_head_attention(xd_n, xd_n, xd_n, *p["self"], h=h, dk=dk, dv=dv, causal=True)
    # TODO(synk): nn.Dropout (training-mode stochastic) modeled as identity (inference).
    cur = x_dec + a1
    cur_n = layernorm(cur)
    xe_n = layernorm(x_enc)
    a2 = multi_head_attention(cur_n, xe_n, xe_n, *p["cross"], h=h, dk=dk, dv=dv, causal=False)
    res = cur + a2
    res_n = layernorm(res)
    ff = feed_forward(res_n, *p["ffn"])
    return res + ff


def decoder(x_enc, x_dec, params, *, h, dk, dv):
    cur = x_dec
    for p in params:
        cur = decoder_block(x_enc, cur, p, h=h, dk=dk, dv=dv)
    return cur


# ---------------------------------------------------------------------------
# Pure-JAX reference (same math & bf16/f32 precision choices as the kernels)
# ---------------------------------------------------------------------------
def _ref_linear(x2d, w, b=None):
    out = jnp.dot(x2d.astype(jnp.bfloat16), w.astype(jnp.bfloat16),
                  preferred_element_type=jnp.float32)
    return out if b is None else out + b


def _ref_layernorm(x):
    mu = jnp.mean(x, axis=(1, 2), keepdims=True)
    xc = x - mu
    var = jnp.mean(xc * xc, axis=(1, 2), keepdims=True)
    return xc * lax.rsqrt(var + 1e-5)


def _ref_mha(q_in, k_in, v_in, wq, wk, wv, wo, *, h, dk, dv, causal):
    B, S, dmodel = q_in.shape
    q = _ref_linear(q_in.reshape(B * S, dmodel), wq).reshape(B, S, h, dk).transpose(0, 2, 1, 3)
    k = _ref_linear(k_in.reshape(B * S, dmodel), wk).reshape(B, S, h, dk).transpose(0, 2, 1, 3)
    v = _ref_linear(v_in.reshape(B * S, dmodel), wv).reshape(B, S, h, dv).transpose(0, 2, 1, 3)
    s = jnp.einsum("bhqd,bhkd->bhqk", q.astype(jnp.bfloat16), k.astype(jnp.bfloat16),
                   preferred_element_type=jnp.float32) * (1.0 / (dk ** 0.5))
    if causal:
        row = lax.broadcasted_iota(jnp.int32, (S, S), 0)
        col = lax.broadcasted_iota(jnp.int32, (S, S), 1)
        s = jnp.where((col > row)[None, None], jnp.float32(-1e30), s)
    s = s - jnp.max(s, axis=-1, keepdims=True)
    p = jnp.exp(s)
    p = p / jnp.sum(p, axis=-1, keepdims=True)
    attn = jnp.einsum("bhqk,bhkd->bhqd", p.astype(jnp.bfloat16), v.astype(jnp.bfloat16),
                      preferred_element_type=jnp.float32)
    concat = attn.transpose(0, 2, 1, 3).reshape(B * S, h * dv)
    return _ref_linear(concat, wo).reshape(B, S, dmodel)


def _ref_ffn(x, w1, b1, w2, b2):
    B, S, D = x.shape
    x2d = x.reshape(B * S, D)
    hmid = jnp.maximum(_ref_linear(x2d, w1, b1), 0.0)
    out = jnp.dot(hmid.astype(jnp.bfloat16), w2.astype(jnp.bfloat16),
                  preferred_element_type=jnp.float32) + b2
    return out.reshape(B, S, D)


def _ref_decoder(x_enc, x_dec, params, *, h, dk, dv):
    cur = x_dec
    for p in params:
        xd_n = _ref_layernorm(cur)
        a1 = _ref_mha(xd_n, xd_n, xd_n, *p["self"], h=h, dk=dk, dv=dv, causal=True)
        c = cur + a1
        c_n = _ref_layernorm(c)
        xe_n = _ref_layernorm(x_enc)
        a2 = _ref_mha(c_n, xe_n, xe_n, *p["cross"], h=h, dk=dk, dv=dv, causal=False)
        r = c + a2
        r_n = _ref_layernorm(r)
        cur = r + _ref_ffn(r_n, *p["ffn"])
    return cur


# ---------------------------------------------------------------------------
# Parameter init (mimics nn.Linear U(-1/sqrt(fan_in), 1/sqrt(fan_in)))
# ---------------------------------------------------------------------------
def _uniform(key, shape, bound):
    return jax.random.uniform(key, shape, jnp.float32, -bound, bound)


def _init_mha(key, h, dmodel, dk, dv):
    k1, k2, k3, k4 = jax.random.split(key, 4)
    bq = 1.0 / (dmodel ** 0.5)
    bo = 1.0 / ((h * dv) ** 0.5)
    return (_uniform(k1, (dmodel, h * dk), bq),
            _uniform(k2, (dmodel, h * dk), bq),
            _uniform(k3, (dmodel, h * dv), bq),
            _uniform(k4, (h * dv, dmodel), bo))


def _init_ffn(key, dmodel, dff):
    k1, k2, k3, k4 = jax.random.split(key, 4)
    b1 = 1.0 / (dmodel ** 0.5)
    b2 = 1.0 / (dff ** 0.5)
    return (_uniform(k1, (dmodel, dff), b1), _uniform(k2, (dff,), b1),
            _uniform(k3, (dff, dmodel), b2), _uniform(k4, (dmodel,), b2))


if __name__ == "__main__":
    # Small shapes consistent with the module (h=8, dmodel=512, dk=dv=64, dff=2048 scaled down).
    B, S = 2, 8
    h, dmodel, dk, dv, dff = 2, 128, 64, 64, 256

    key = jax.random.PRNGKey(0)
    kenc, kdec, kpar = jax.random.split(key, 3)
    x_enc = jax.random.normal(kenc, (B, S, dmodel), jnp.float32)
    x_dec = jax.random.normal(kdec, (B, S, dmodel), jnp.float32)

    params = []
    for _ in range(3):
        kpar, ka, kb, kc = jax.random.split(kpar, 4)
        params.append({
            "self": _init_mha(ka, h, dmodel, dk, dv),
            "cross": _init_mha(kb, h, dmodel, dk, dv),
            "ffn": _init_ffn(kc, dmodel, dff),
        })

    decoder_fn = jax.jit(functools.partial(decoder, h=h, dk=dk, dv=dv))
    out = decoder_fn(x_enc, x_dec, params)
    jax.block_until_ready(out)

    ref = _ref_decoder(x_enc, x_dec, params, h=h, dk=dk, dv=dv)
    assert out.shape == (B, S, dmodel)
    assert jnp.allclose(out, ref, atol=2e-3, rtol=2e-3), "mismatch vs reference"

    print("KERNEL_OK")
</pallas_src>

<mosaic_0001>
module attributes {stable_mosaic.version = 11 : i64} {
  func.func @_layernorm_kernel(%arg0: i32, %arg1: memref<1x8x128xf32, #tpu.memory_space<vmem>>, %arg2: memref<1x8x128xf32, #tpu.memory_space<vmem>>) attributes {dimension_semantics = [#tpu.dimension_semantics<parallel>], iteration_bounds = array<i64: 2>, scalar_prefetch = 0 : i64, scratch_operands = 0 : i64, tpu.core_type = #tpu.core_type<tc>, window_params = [{transform_indices = @transform_0, window_bounds = array<i64: 1, 8, 128>}, {transform_indices = @transform_1, window_bounds = array<i64: 1, 8, 128>}]} {
    %c0 = arith.constant 0 : index
    %c0_0 = arith.constant 0 : index
    %c0_1 = arith.constant 0 : index
    %0 = vector.load %arg1[%c0, %c0_0, %c0_1] : memref<1x8x128xf32, #tpu.memory_space<vmem>>, vector<1x8x128xf32>
    %1 = vector.shape_cast %0 : vector<1x8x128xf32> to vector<8x128xf32>
    %2 = vector.shape_cast %1 : vector<8x128xf32> to vector<1x8x128xf32>
    %cst = arith.constant dense<0.000000e+00> : vector<1xf32>
    %3 = vector.multi_reduction <add>, %2, %cst [1, 2] : vector<1x8x128xf32> to vector<1xf32>
    %4 = vector.shape_cast %3 : vector<1xf32> to vector<1x1x1xf32>
    %5 = vector.extract %4[0, 0, 0] : f32 from vector<1x1x1xf32>
    %6 = vector.broadcast %5 : f32 to vector<1x1xf32>
    %cst_2 = arith.constant 1.024000e+03 : f32
    %7 = vector.broadcast %cst_2 : f32 to vector<1x1xf32>
    %8 = arith.divf %6, %7 : vector<1x1xf32>
    %9 = vector.broadcast %8 : vector<1x1xf32> to vector<8x128xf32>
    %10 = arith.subf %1, %9 : vector<8x128xf32>
    %11 = arith.mulf %10, %10 : vector<8x128xf32>
    %12 = vector.shape_cast %11 : vector<8x128xf32> to vector<1x8x128xf32>
    %cst_3 = arith.constant dense<0.000000e+00> : vector<1xf32>
    %13 = vector.multi_reduction <add>, %12, %cst_3 [1, 2] : vector<1x8x128xf32> to vector<1xf32>
    %14 = vector.shape_cast %13 : vector<1xf32> to vector<1x1x1xf32>
    %15 = vector.extract %14[0, 0, 0] : f32 from vector<1x1x1xf32>
    %16 = vector.broadcast %15 : f32 to vector<1x1xf32>
    %cst_4 = arith.constant 1.024000e+03 : f32
    %17 = vector.broadcast %cst_4 : f32 to vector<1x1xf32>
    %18 = arith.divf %16, %17 : vector<1x1xf32>
    %cst_5 = arith.constant 9.99999974E-6 : f32
    %19 = vector.broadcast %cst_5 : f32 to vector<1x1xf32>
    %20 = arith.addf %18, %19 : vector<1x1xf32>
    %21 = math.rsqrt %20 : vector<1x1xf32>
    %22 = vector.broadcast %21 : vector<1x1xf32> to vector<8x128xf32>
    %23 = arith.mulf %10, %22 : vector<8x128xf32>
    %c0_6 = arith.constant 0 : index
    %c0_7 = arith.constant 0 : index
    %c0_8 = arith.constant 0 : index
    %24 = vector.load %arg2[%c0_6, %c0_7, %c0_8] : memref<1x8x128xf32, #tpu.memory_space<vmem>>, vector<1x8x128xf32>
    %25 = vector.shape_cast %24 : vector<1x8x128xf32> to vector<8x128xf32>
    %26 = vector.shape_cast %23 : vector<8x128xf32> to vector<1x8x128xf32>
    tpu.vector_store %arg2[%c0_6, %c0_7, %c0_8], %26 {strides = array<i32>} : memref<1x8x128xf32, #tpu.memory_space<vmem>>, vector<1x8x128xf32>,
    return
  }
  func.func @transform_0(%arg0: i32) -> (i32, i32, i32) {
    %c0_i32 = arith.constant 0 : i32
    %c0_i32_0 = arith.constant 0 : i32
    %c0_i32_1 = arith.constant 0 : i32
    return %arg0, %c0_i32, %c0_i32_0 : i32, i32, i32
  }
  func.func @transform_1(%arg0: i32) -> (i32, i32, i32) {
    %c0_i32 = arith.constant 0 : i32
    %c0_i32_0 = arith.constant 0 : i32
    %c0_i32_1 = arith.constant 0 : i32
    return %arg0, %c0_i32, %c0_i32_0 : i32, i32, i32
  }
}

module attributes {stable_mosaic.version = 11 : i64} {
  func.func @_linear_kernel(%arg0: i32, %arg1: memref<16x128xbf16, #tpu.memory_space<vmem>>, %arg2: memref<128x128xbf16, #tpu.memory_space<vmem>>, %arg3: memref<1x128xf32, #tpu.memory_space<vmem>>, %arg4: memref<16x128xf32, #tpu.memory_space<vmem>>) attributes {dimension_semantics = [#tpu.dimension_semantics<parallel>], iteration_bounds = array<i64: 1>, scalar_prefetch = 0 : i64, scratch_operands = 0 : i64, tpu.core_type = #tpu.core_type<tc>, window_params = [{transform_indices = @transform_0, window_bounds = array<i64: 16, 128>}, {pipeline_mode = #tpu.pipeline_mode<synchronous>, transform_indices = @transform_1, window_bounds = array<i64: 128, 128>}, {pipeline_mode = #tpu.pipeline_mode<synchronous>, transform_indices = @transform_2, window_bounds = array<i64: 1, 128>}, {transform_indices = @transform_3, window_bounds = array<i64: 16, 128>}]} {
    %c0 = arith.constant 0 : index
    %c0_0 = arith.constant 0 : index
    %0 = vector.load %arg1[%c0, %c0_0] : memref<16x128xbf16, #tpu.memory_space<vmem>>, vector<16x128xbf16>
    %c0_1 = arith.constant 0 : index
    %c0_2 = arith.constant 0 : index
    %1 = vector.load %arg2[%c0_1, %c0_2] : memref<128x128xbf16, #tpu.memory_space<vmem>>, vector<128x128xbf16>
    %cst = arith.constant dense<0.000000e+00> : vector<16x128xf32>
    %2 = tpu.matmul %0, %1, %cst {dimension_numbers = #tpu.dot_dimension_numbers<[1], [0], [0], [1], [0, 0, 1, 1], [], []>} : vector<16x128xbf16>, vector<128x128xbf16>, vector<16x128xf32> -> vector<16x128xf32>
    %c0_3 = arith.constant 0 : index
    %c0_4 = arith.constant 0 : index
    %3 = vector.load %arg3[%c0_3, %c0_4] : memref<1x128xf32, #tpu.memory_space<vmem>>, vector<1x128xf32>
    %4 = vector.broadcast %3 : vector<1x128xf32> to vector<16x128xf32>
    %5 = arith.addf %2, %4 : vector<16x128xf32>
    %c0_5 = arith.constant 0 : index
    %c0_6 = arith.constant 0 : index
    %6 = vector.load %arg4[%c0_5, %c0_6] : memref<16x128xf32, #tpu.memory_space<vmem>>, vector<16x128xf32>
    tpu.vector_store %arg4[%c0_5, %c0_6], %5 {strides = array<i32>} : memref<16x128xf32, #tpu.memory_space<vmem>>, vector<16x128xf32>,
    return
  }
  func.func @transform_0(%arg0: i32) -> (i32, i32) {
    %c0_i32 = arith.constant 0 : i32
    %c0_i32_0 = arith.constant 0 : i32
    return %arg0, %c0_i32 : i32, i32
  }
  func.func @transform_1(%arg0: i32) -> (i32, i32) {
    %c0_i32 = arith.constant 0 : i32
    %c0_i32_0 = arith.constant 0 : i32
    %c0_i32_1 = arith.constant 0 : i32
    return %c0_i32, %c0_i32_0 : i32, i32
  }
  func.func @transform_2(%arg0: i32) -> (i32, i32) {
    %c0_i32 = arith.constant 0 : i32
    %c0_i32_0 = arith.constant 0 : i32
    %c0_i32_1 = arith.constant 0 : i32
    return %c0_i32, %c0_i32_0 : i32, i32
  }
  func.func @transform_3(%arg0: i32) -> (i32, i32) {
    %c0_i32 = arith.constant 0 : i32
    %c0_i32_0 = arith.constant 0 : i32
    return %arg0, %c0_i32 : i32, i32
  }
}

module attributes {stable_mosaic.version = 11 : i64} {
  func.func @_attn_kernel(%arg0: i32, %arg1: i32, %arg2: memref<1x1x8x64xf32, #tpu.memory_space<vmem>>, %arg3: memref<1x1x8x64xf32, #tpu.memory_space<vmem>>, %arg4: memref<1x1x8x64xf32, #tpu.memory_space<vmem>>, %arg5: memref<1x1x8x64xf32, #tpu.memory_space<vmem>>) attributes {dimension_semantics = [#tpu.dimension_semantics<parallel>, #tpu.dimension_semantics<parallel>], iteration_bounds = array<i64: 2, 2>, scalar_prefetch = 0 : i64, scratch_operands = 0 : i64, tpu.core_type = #tpu.core_type<tc>, window_params = [{transform_indices = @transform_0, window_bounds = array<i64: 1, 1, 8, 64>}, {transform_indices = @transform_1, window_bounds = array<i64: 1, 1, 8, 64>}, {transform_indices = @transform_2, window_bounds = array<i64: 1, 1, 8, 64>}, {transform_indices = @transform_3, window_bounds = array<i64: 1, 1, 8, 64>}]} {
    %c0 = arith.constant 0 : index
    %c0_0 = arith.constant 0 : index
    %c0_1 = arith.constant 0 : index
    %c0_2 = arith.constant 0 : index
    %0 = vector.load %arg2[%c0, %c0_0, %c0_1, %c0_2] : memref<1x1x8x64xf32, #tpu.memory_space<vmem>>, vector<1x1x8x64xf32>
    %1 = vector.shape_cast %0 : vector<1x1x8x64xf32> to vector<8x64xf32>
    %2 = arith.truncf %1 : vector<8x64xf32> to vector<8x64xbf16>
    %c0_3 = arith.constant 0 : index
    %c0_4 = arith.constant 0 : index
    %c0_5 = arith.constant 0 : index
    %c0_6 = arith.constant 0 : index
    %3 = vector.load %arg3[%c0_3, %c0_4, %c0_5, %c0_6] : memref<1x1x8x64xf32, #tpu.memory_space<vmem>>, vector<1x1x8x64xf32>
    %4 = vector.shape_cast %3 : vector<1x1x8x64xf32> to vector<8x64xf32>
    %5 = arith.truncf %4 : vector<8x64xf32> to vector<8x64xbf16>
    %cst = arith.constant dense<0.000000e+00> : vector<8x8xf32>
    %6 = tpu.matmul %2, %5, %cst {dimension_numbers = #tpu.dot_dimension_numbers<[1], [1], [0], [0], [0, 0, 1, 0], [], []>} : vector<8x64xbf16>, vector<8x64xbf16>, vector<8x8xf32> -> vector<8x8xf32>
    %cst_7 = arith.constant 1.250000e-01 : f32
    %7 = vector.broadcast %cst_7 : f32 to vector<8x8xf32>
    %8 = arith.mulf %6, %7 : vector<8x8xf32>
    %9 = tpu.iota {dimensions = array<i32: 0>} : vector<8x8xi32>
    %10 = tpu.iota {dimensions = array<i32: 1>} : vector<8x8xi32>
    %11 = arith.cmpi sgt, %10, %9 : vector<8x8xi32>
    %cst_8 = arith.constant -1.000000e+30 : f32
    %12 = vector.broadcast %cst_8 : f32 to vector<8x8xf32>
    %13 = arith.select %11, %12, %8 : vector<8x8xi1>, vector<8x8xf32>
    %cst_9 = arith.constant dense<0xFF800000> : vector<8xf32>
    %14 = vector.multi_reduction <maximumf>, %13, %cst_9 [1] : vector<8x8xf32> to vector<8xf32>
    %15 = vector.shape_cast %14 : vector<8xf32> to vector<8x1xf32>
    %16 = vector.broadcast %15 : vector<8x1xf32> to vector<8x8xf32>
    %17 = arith.subf %13, %16 : vector<8x8xf32>
    %18 = math.exp %17 : vector<8x8xf32>
    %cst_10 = arith.constant dense<0.000000e+00> : vector<8xf32>
    %19 = vector.multi_reduction <add>, %18, %cst_10 [1] : vector<8x8xf32> to vector<8xf32>
    %20 = vector.shape_cast %19 : vector<8xf32> to vector<8x1xf32>
    %21 = vector.broadcast %20 : vector<8x1xf32> to vector<8x8xf32>
    %22 = arith.divf %18, %21 : vector<8x8xf32>
    %c0_11 = arith.constant 0 : index
    %c0_12 = arith.constant 0 : index
    %c0_13 = arith.constant 0 : index
    %c0_14 = arith.constant 0 : index
    %23 = vector.load %arg4[%c0_11, %c0_12, %c0_13, %c0_14] : memref<1x1x8x64xf32, #tpu.memory_space<vmem>>, vector<1x1x8x64xf32>
    %24 = vector.shape_cast %23 : vector<1x1x8x64xf32> to vector<8x64xf32>
    %25 = arith.truncf %24 : vector<8x64xf32> to vector<8x64xbf16>
    %26 = arith.truncf %22 : vector<8x8xf32> to vector<8x8xbf16>
    %cst_15 = arith.constant dense<0.000000e+00> : vector<8x64xf32>
    %27 = tpu.matmul %26, %25, %cst_15 {dimension_numbers = #tpu.dot_dimension_numbers<[1], [0], [0], [1], [0, 0, 1, 1], [], []>} : vector<8x8xbf16>, vector<8x64xbf16>, vector<8x64xf32> -> vector<8x64xf32>
    %c0_16 = arith.constant 0 : index
    %c0_17 = arith.constant 0 : index
    %c0_18 = arith.constant 0 : index
    %c0_19 = arith.constant 0 : index
    %28 = vector.load %arg5[%c0_16, %c0_17, %c0_18, %c0_19] : memref<1x1x8x64xf32, #tpu.memory_space<vmem>>, vector<1x1x8x64xf32>
    %29 = vector.shape_cast %28 : vector<1x1x8x64xf32> to vector<8x64xf32>
    %30 = vector.shape_cast %27 : vector<8x64xf32> to vector<1x1x8x64xf32>
    tpu.vector_store %arg5[%c0_16, %c0_17, %c0_18, %c0_19], %30 {strides = array<i32>} : memref<1x1x8x64xf32, #tpu.memory_space<vmem>>, vector<1x1x8x64xf32>,
    return
  }
  func.func @transform_0(%arg0: i32, %arg1: i32) -> (i32, i32, i32, i32) {
    %c0_i32 = arith.constant 0 : i32
    %c0_i32_0 = arith.constant 0 : i32
    %c0_i32_1 = arith.constant 0 : i32
    return %arg0, %arg1, %c0_i32, %c0_i32_0 : i32, i32, i32, i32
  }
  func.func @transform_1(%arg0: i32, %arg1: i32) -> (i32, i32, i32, i32) {
    %c0_i32 = arith.constant 0 : i32
    %c0_i32_0 = arith.constant 0 : i32
    %c0_i32_1 = arith.constant 0 : i32
    return %arg0, %arg1, %c0_i32, %c0_i32_0 : i32, i32, i32, i32
  }
  func.func @transform_2(%arg0: i32, %arg1: i32) -> (i32, i32, i32, i32) {
    %c0_i32 = arith.constant 0 : i32
    %c0_i32_0 = arith.constant 0 : i32
    %c0_i32_1 = arith.constant 0 : i32
    return %arg0, %arg1, %c0_i32, %c0_i32_0 : i32, i32, i32, i32
  }
  func.func @transform_3(%arg0: i32, %arg1: i32) -> (i32, i32, i32, i32) {
    %c0_i32 = arith.constant 0 : i32
    %c0_i32_0 = arith.constant 0 : i32
    %c0_i32_1 = arith.constant 0 : i32
    return %arg0, %arg1, %c0_i32, %c0_i32_0 : i32, i32, i32, i32
  }
}

module attributes {stable_mosaic.version = 11 : i64} {
  func.func @_attn_kernel(%arg0: i32, %arg1: i32, %arg2: memref<1x1x8x64xf32, #tpu.memory_space<vmem>>, %arg3: memref<1x1x8x64xf32, #tpu.memory_space<vmem>>, %arg4: memref<1x1x8x64xf32, #tpu.memory_space<vmem>>, %arg5: memref<1x1x8x64xf32, #tpu.memory_space<vmem>>) attributes {dimension_semantics = [#tpu.dimension_semantics<parallel>, #tpu.dimension_semantics<parallel>], iteration_bounds = array<i64: 2, 2>, scalar_prefetch = 0 : i64, scratch_operands = 0 : i64, tpu.core_type = #tpu.core_type<tc>, window_params = [{transform_indices = @transform_0, window_bounds = array<i64: 1, 1, 8, 64>}, {transform_indices = @transform_1, window_bounds = array<i64: 1, 1, 8, 64>}, {transform_indices = @transform_2, window_bounds = array<i64: 1, 1, 8, 64>}, {transform_indices = @transform_3, window_bounds = array<i64: 1, 1, 8, 64>}]} {
    %c0 = arith.constant 0 : index
    %c0_0 = arith.constant 0 : index
    %c0_1 = arith.constant 0 : index
    %c0_2 = arith.constant 0 : index
    %0 = vector.load %arg2[%c0, %c0_0, %c0_1, %c0_2] : memref<1x1x8x64xf32, #tpu.memory_space<vmem>>, vector<1x1x8x64xf32>
    %1 = vector.shape_cast %0 : vector<1x1x8x64xf32> to vector<8x64xf32>
    %2 = arith.truncf %1 : vector<8x64xf32> to vector<8x64xbf16>
    %c0_3 = arith.constant 0 : index
    %c0_4 = arith.constant 0 : index
    %c0_5 = arith.constant 0 : index
    %c0_6 = arith.constant 0 : index
    %3 = vector.load %arg3[%c0_3, %c0_4, %c0_5, %c0_6] : memref<1x1x8x64xf32, #tpu.memory_space<vmem>>, vector<1x1x8x64xf32>
    %4 = vector.shape_cast %3 : vector<1x1x8x64xf32> to vector<8x64xf32>
    %5 = arith.truncf %4 : vector<8x64xf32> to vector<8x64xbf16>
    %cst = arith.constant dense<0.000000e+00> : vector<8x8xf32>
    %6 = tpu.matmul %2, %5, %cst {dimension_numbers = #tpu.dot_dimension_numbers<[1], [1], [0], [0], [0, 0, 1, 0], [], []>} : vector<8x64xbf16>, vector<8x64xbf16>, vector<8x8xf32> -> vector<8x8xf32>
    %cst_7 = arith.constant 1.250000e-01 : f32
    %7 = vector.broadcast %cst_7 : f32 to vector<8x8xf32>
    %8 = arith.mulf %6, %7 : vector<8x8xf32>
    %cst_8 = arith.constant dense<0xFF800000> : vector<8xf32>
    %9 = vector.multi_reduction <maximumf>, %8, %cst_8 [1] : vector<8x8xf32> to vector<8xf32>
    %10 = vector.shape_cast %9 : vector<8xf32> to vector<8x1xf32>
    %11 = vector.broadcast %10 : vector<8x1xf32> to vector<8x8xf32>
    %12 = arith.subf %8, %11 : vector<8x8xf32>
    %13 = math.exp %12 : vector<8x8xf32>
    %cst_9 = arith.constant dense<0.000000e+00> : vector<8xf32>
    %14 = vector.multi_reduction <add>, %13, %cst_9 [1] : vector<8x8xf32> to vector<8xf32>
    %15 = vector.shape_cast %14 : vector<8xf32> to vector<8x1xf32>
    %16 = vector.broadcast %15 : vector<8x1xf32> to vector<8x8xf32>
    %17 = arith.divf %13, %16 : vector<8x8xf32>
    %c0_10 = arith.constant 0 : index
    %c0_11 = arith.constant 0 : index
    %c0_12 = arith.constant 0 : index
    %c0_13 = arith.constant 0 : index
    %18 = vector.load %arg4[%c0_10, %c0_11, %c0_12, %c0_13] : memref<1x1x8x64xf32, #tpu.memory_space<vmem>>, vector<1x1x8x64xf32>
    %19 = vector.shape_cast %18 : vector<1x1x8x64xf32> to vector<8x64xf32>
    %20 = arith.truncf %19 : vector<8x64xf32> to vector<8x64xbf16>
    %21 = arith.truncf %17 : vector<8x8xf32> to vector<8x8xbf16>
    %cst_14 = arith.constant dense<0.000000e+00> : vector<8x64xf32>
    %22 = tpu.matmul %21, %20, %cst_14 {dimension_numbers = #tpu.dot_dimension_numbers<[1], [0], [0], [1], [0, 0, 1, 1], [], []>} : vector<8x8xbf16>, vector<8x64xbf16>, vector<8x64xf32> -> vector<8x64xf32>
    %c0_15 = arith.constant 0 : index
    %c0_16 = arith.constant 0 : index
    %c0_17 = arith.constant 0 : index
    %c0_18 = arith.constant 0 : index
    %23 = vector.load %arg5[%c0_15, %c0_16, %c0_17, %c0_18] : memref<1x1x8x64xf32, #tpu.memory_space<vmem>>, vector<1x1x8x64xf32>
    %24 = vector.shape_cast %23 : vector<1x1x8x64xf32> to vector<8x64xf32>
    %25 = vector.shape_cast %22 : vector<8x64xf32> to vector<1x1x8x64xf32>
    tpu.vector_store %arg5[%c0_15, %c0_16, %c0_17, %c0_18], %25 {strides = array<i32>} : memref<1x1x8x64xf32, #tpu.memory_space<vmem>>, vector<1x1x8x64xf32>,
    return
  }
  func.func @transform_0(%arg0: i32, %arg1: i32) -> (i32, i32, i32, i32) {
    %c0_i32 = arith.constant 0 : i32
    %c0_i32_0 = arith.constant 0 : i32
    %c0_i32_1 = arith.constant 0 : i32
    return %arg0, %arg1, %c0_i32, %c0_i32_0 : i32, i32, i32, i32
  }
  func.func @transform_1(%arg0: i32, %arg1: i32) -> (i32, i32, i32, i32) {
    %c0_i32 = arith.constant 0 : i32
    %c0_i32_0 = arith.constant 0 : i32
    %c0_i32_1 = arith.constant 0 : i32
    return %arg0, %arg1, %c0_i32, %c0_i32_0 : i32, i32, i32, i32
  }
  func.func @transform_2(%arg0: i32, %arg1: i32) -> (i32, i32, i32, i32) {
    %c0_i32 = arith.constant 0 : i32
    %c0_i32_0 = arith.constant 0 : i32
    %c0_i32_1 = arith.constant 0 : i32
    return %arg0, %arg1, %c0_i32, %c0_i32_0 : i32, i32, i32, i32
  }
  func.func @transform_3(%arg0: i32, %arg1: i32) -> (i32, i32, i32, i32) {
    %c0_i32 = arith.constant 0 : i32
    %c0_i32_0 = arith.constant 0 : i32
    %c0_i32_1 = arith.constant 0 : i32
    return %arg0, %arg1, %c0_i32, %c0_i32_0 : i32, i32, i32, i32
  }
}

module attributes {stable_mosaic.version = 11 : i64} {
  func.func @_ffn_kernel(%arg0: i32, %arg1: i32, %arg2: memref<16x128xbf16, #tpu.memory_space<vmem>>, %arg3: memref<128x256xbf16, #tpu.memory_space<vmem>>, %arg4: memref<1x256xf32, #tpu.memory_space<vmem>>, %arg5: memref<256x128xbf16, #tpu.memory_space<vmem>>, %arg6: memref<1x128xf32, #tpu.memory_space<vmem>>, %arg7: memref<16x128xf32, #tpu.memory_space<vmem>>, %arg8: memref<16x128xf32, #tpu.memory_space<vmem>>) attributes {dimension_semantics = [#tpu.dimension_semantics<parallel>, #tpu.dimension_semantics<arbitrary>], iteration_bounds = array<i64: 1, 1>, scalar_prefetch = 0 : i64, scratch_operands = 1 : i64, tpu.core_type = #tpu.core_type<tc>, window_params = [{transform_indices = @transform_0, window_bounds = array<i64: 16, 128>}, {transform_indices = @transform_1, window_bounds = array<i64: 128, 256>}, {transform_indices = @transform_2, window_bounds = array<i64: 1, 256>}, {transform_indices = @transform_3, window_bounds = array<i64: 256, 128>}, {pipeline_mode = #tpu.pipeline_mode<synchronous>, transform_indices = @transform_4, window_bounds = array<i64: 1, 128>}, {transform_indices = @transform_5, window_bounds = array<i64: 16, 128>}]} {
    %c0_i32 = arith.constant 0 : i32
    %0 = arith.cmpi eq, %arg1, %c0_i32 : i32
    %1 = arith.extui %0 : i1 to i32
    %c0_i32_0 = arith.constant 0 : i32
    %2 = arith.cmpi ne, %1, %c0_i32_0 : i32
    scf.if %2 {
      %cst_16 = arith.constant 0.000000e+00 : f32
      %20 = vector.broadcast %cst_16 : f32 to vector<16x128xf32>
      %c0_17 = arith.constant 0 : index
      %c0_18 = arith.constant 0 : index
      %21 = vector.load %arg8[%c0_17, %c0_18] : memref<16x128xf32, #tpu.memory_space<vmem>>, vector<16x128xf32>
      tpu.vector_store %arg8[%c0_17, %c0_18], %20 {strides = array<i32>} : memref<16x128xf32, #tpu.memory_space<vmem>>, vector<16x128xf32>,
    } else {
    }
    %c0 = arith.constant 0 : index
    %c0_1 = arith.constant 0 : index
    %3 = vector.load %arg2[%c0, %c0_1] : memref<16x128xbf16, #tpu.memory_space<vmem>>, vector<16x128xbf16>
    %c0_2 = arith.constant 0 : index
    %c0_3 = arith.constant 0 : index
    %4 = vector.load %arg3[%c0_2, %c0_3] : memref<128x256xbf16, #tpu.memory_space<vmem>>, vector<128x256xbf16>
    %cst = arith.constant dense<0.000000e+00> : vector<16x256xf32>
    %5 = tpu.matmul %3, %4, %cst {dimension_numbers = #tpu.dot_dimension_numbers<[1], [0], [0], [1], [0, 0, 1, 1], [], []>} : vector<16x128xbf16>, vector<128x256xbf16>, vector<16x256xf32> -> vector<16x256xf32>
    %c0_4 = arith.constant 0 : index
    %c0_5 = arith.constant 0 : index
    %6 = vector.load %arg4[%c0_4, %c0_5] : memref<1x256xf32, #tpu.memory_space<vmem>>, vector<1x256xf32>
    %7 = vector.broadcast %6 : vector<1x256xf32> to vector<16x256xf32>
    %8 = arith.addf %5, %7 : vector<16x256xf32>
    %cst_6 = arith.constant 0.000000e+00 : f32
    %9 = vector.broadcast %cst_6 : f32 to vector<16x256xf32>
    %10 = arith.maximumf %8, %9 : vector<16x256xf32>
    %c0_7 = arith.constant 0 : index
    %c0_8 = arith.constant 0 : index
    %11 = vector.load %arg8[%c0_7, %c0_8] : memref<16x128xf32, #tpu.memory_space<vmem>>, vector<16x128xf32>
    %12 = arith.truncf %10 : vector<16x256xf32> to vector<16x256xbf16>
    %c0_9 = arith.constant 0 : index
    %c0_10 = arith.constant 0 : index
    %13 = vector.load %arg5[%c0_9, %c0_10] : memref<256x128xbf16, #tpu.memory_space<vmem>>, vector<256x128xbf16>
    %cst_11 = arith.constant dense<0.000000e+00> : vector<16x128xf32>
    %14 = tpu.matmul %12, %13, %cst_11 {dimension_numbers = #tpu.dot_dimension_numbers<[1], [0], [0], [1], [0, 0, 1, 1], [], []>} : vector<16x256xbf16>, vector<256x128xbf16>, vector<16x128xf32> -> vector<16x128xf32>
    %15 = arith.addf %11, %14 : vector<16x128xf32>
    %c0_12 = arith.constant 0 : index
    %c0_13 = arith.constant 0 : index
    %16 = vector.load %arg8[%c0_12, %c0_13] : memref<16x128xf32, #tpu.memory_space<vmem>>, vector<16x128xf32>
    tpu.vector_store %arg8[%c0_12, %c0_13], %15 {strides = array<i32>} : memref<16x128xf32, #tpu.memory_space<vmem>>, vector<16x128xf32>,
    %c0_i32_14 = arith.constant 0 : i32
    %17 = arith.cmpi eq, %arg1, %c0_i32_14 : i32
    %18 = arith.extui %17 : i1 to i32
    %c0_i32_15 = arith.constant 0 : i32
    %19 = arith.cmpi ne, %18, %c0_i32_15 : i32
    scf.if %19 {
      %c0_16 = arith.constant 0 : index
      %c0_17 = arith.constant 0 : index
      %20 = vector.load %arg8[%c0_16, %c0_17] : memref<16x128xf32, #tpu.memory_space<vmem>>, vector<16x128xf32>
      %c0_18 = arith.constant 0 : index
      %c0_19 = arith.constant 0 : index
      %21 = vector.load %arg6[%c0_18, %c0_19] : memref<1x128xf32, #tpu.memory_space<vmem>>, vector<1x128xf32>
      %22 = vector.broadcast %21 : vector<1x128xf32> to vector<16x128xf32>
      %23 = arith.addf %20, %22 : vector<16x128xf32>
      %c0_20 = arith.constant 0 : index
      %c0_21 = arith.constant 0 : index
      %24 = vector.load %arg7[%c0_20, %c0_21] : memref<16x128xf32, #tpu.memory_space<vmem>>, vector<16x128xf32>
      tpu.vector_store %arg7[%c0_20, %c0_21], %23 {strides = array<i32>} : memref<16x128xf32, #tpu.memory_space<vmem>>, vector<16x128xf32>,
    } else {
    }
    return
  }
  func.func @transform_0(%arg0: i32, %arg1: i32) -> (i32, i32) {
    %c0_i32 = arith.constant 0 : i32
    %c0_i32_0 = arith.constant 0 : i32
    return %arg0, %c0_i32 : i32, i32
  }
  func.func @transform_1(%arg0: i32, %arg1: i32) -> (i32, i32) {
    %c0_i32 = arith.constant 0 : i32
    %c0_i32_0 = arith.constant 0 : i32
    return %c0_i32, %arg1 : i32, i32
  }
  func.func @transform_2(%arg0: i32, %arg1: i32) -> (i32, i32) {
    %c0_i32 = arith.constant 0 : i32
    %c0_i32_0 = arith.constant 0 : i32
    return %c0_i32, %arg1 : i32, i32
  }
  func.func @transform_3(%arg0: i32, %arg1: i32) -> (i32, i32) {
    %c0_i32 = arith.constant 0 : i32
    %c0_i32_0 = arith.constant 0 : i32
    return %arg1, %c0_i32 : i32, i32
  }
  func.func @transform_4(%arg0: i32, %arg1: i32) -> (i32, i32) {
    %c0_i32 = arith.constant 0 : i32
    %c0_i32_0 = arith.constant 0 : i32
    %c0_i32_1 = arith.constant 0 : i32
    return %c0_i32, %c0_i32_0 : i32, i32
  }
  func.func @transform_5(%arg0: i32, %arg1: i32) -> (i32, i32) {
    %c0_i32 = arith.constant 0 : i32
    %c0_i32_0 = arith.constant 0 : i32
    return %arg0, %c0_i32 : i32, i32
  }
}

</mosaic_0001>

<bundles_post_ra>
// kernel: decoder.45
= control target key start
LH: loop header
LB: loop body
LE: loop exit
PB: predicated region body
PF: predicated region fallthrough
CT: control target
= control target key end

     0   :  { %s236_s6 = smov 0   ;;  %s260_s0 = inlined_call_operand.vmem [shape: f32[2,8,128], index: 0, kind: input, shape index: {}]   ;;  %s261_s1 = inlined_call_operand.vmem [shape: f32[2,8,128], index: 1, kind: output, shape index: {}]  }
   0x1 LB: > { %s195_s7 = sadd.s32 4294967295, %s224_s6   ;;  %p199_p0 = scmp.ge.s32.totalorder %s224_s6, 1  ;;  %s224_s6 = sphi %s236_s6, %s11_s6  }
   0x2   : > { %p86_p1 = scmp.lt.s32.totalorder %s224_s6, 3 }
   0x4   : > { %p87_p2 = pnand %p199_p0, %p86_p1 }
   0x5   : > { %p104_p3 = scmp.lt.s32.totalorder (!%p87_p2), %s195_s7, 1 }
   0x6   : > { %90 = sbr.rel (%p87_p2) target bundleno = 451 (0x1c3), region = 24 }
   0xd   : > { %s263_s7 = smov (!%p104_p3, %s195_s7), 1 }
   0xe   : > { %s200_s8 = sshll.u32 %s263_s7, 3 }
   0xf   : > { %s107_s11 = scalar_lea.vmem %s260_s0, %s200_s8  ;;  %s111_s16 = scalar_lea.vmem %s261_s1, %s200_s8 }
  0x10   : > { %v112_v0 = vld [vmem:[%s107_s11] sm:$0xff] }
  0x11   : > { %113 = vadd.xlane.f32.xlu0 %v112_v0 }
  0x9e   : > { %v114_v1 = vpop.xlane.xlu0 %113 }
  0x9f   : > { %v115_v2 = vrot.slane %v114_v1, 4 }
  0xa1   : > { %v116_v3 = vadd.f32 %v115_v2, %v114_v1 }
  0xa3   : > { %v117_v4 = vrot.slane %v116_v3, 2 }
  0xa5   : > { %v118_v5 = vadd.f32 %v117_v4, %v116_v3 }
  0xa7   : > { %v119_v6 = vrot.slane %v118_v5, 1 }
  0xa9   : > { %v120_v7 = vadd.f32 %v119_v6, %v118_v5 }
  0xab   : > { %204 = vpush %v120_v7 }
  0xdc   : > { %s205_s12 = spop %204 }
  0xdd   : > { %v122_v8 = vstv %s205_s12 }
  0xde   : > { %v124_v9 = vmul.f32 0.0009765625, %v122_v8 }
  0xe0   : > { %v125_v10 = vsub.f32 %v112_v0, %v124_v9 }
  0xe2   : > { %v126_v11 = vmul.f32 %v125_v10, %v125_v10 }
  0xe4   : > { %127 = vadd.xlane.f32.xlu0 %v126_v11 }
 0x171   : > { %v128_v12 = vpop.xlane.xlu0 %127 }
 0x172   : > { %v129_v13 = vrot.slane %v128_v12, 4 }
 0x174   : > { %v130_v14 = vadd.f32 %v129_v13, %v128_v12 }
 0x176   : > { %v131_v15 = vrot.slane %v130_v14, 2 }
 0x178   : > { %v132_v16 = vadd.f32 %v131_v15, %v130_v14 }
 0x17a   : > { %v133_v17 = vrot.slane %v132_v16, 1 }
 0x17c   : > { %v134_v18 = vadd.f32 %v133_v17, %v132_v16 }
 0x17e   : > { %206 = vpush %v134_v18 }
 0x1af   : > { %s207_s13 = spop %206 }
 0x1b0   : > { %v136_v19 = vstv %s207_s13 }
 0x1b1   : > { %v137_v20 = vmul.f32 0.0009765625, %v136_v19 }
 0x1b3   : > { %v138_v21 = vadd.f32 1e-05, %v137_v20 }
 0x1b5   : > { %216 = vrsqrt.f32 %v138_v21 }
 0x1bf   : > { %v217_v22 = vpop.eup %216 }
 0x1c0   : > { %v140_v23 = vmul.f32 %v217_v22, %v125_v10 }
 0x1c2   : > { %141 = vst [vmem:[%s111_s16] sm:$0xff] %v140_v23 }
 0x1c3 PF: > { %s11_s6 = sadd.s32 1, %s224_s6  }
 0x1c4   : > { %p8_p4 = scmp.ge.s32.totalorder %s11_s6, 4  }
 0x1c6   :  { %10 = sbr.rel (!%p8_p4) target bundleno = 1 (0x1), region = 54 }

// kernel: decoder.47
= control target key start
LH: loop header
LB: loop body
LE: loop exit
PB: predicated region body
PF: predicated region fallthrough
CT: control target
= control target key end

     0   :  { %v191_v0 = vmov 0.0   ;;  %vm192_vm0 = vmmov 0   ;;  %s249_s1 = inlined_call_operand.vmem [shape: bf16[128,128], index: 1, kind: input, shape index: {}]   ;;  %s250_s0 = inlined_call_operand.vmem [shape: bf16[16,128], index: 0, kind: input, shape index: {}]   ;;  %s251_s2 = inlined_call_operand.vmem [shape: f32[1,128], index: 2, kind: input, shape index: {}]   ;;  %s252_s3 = inlined_call_operand.vmem [shape: f32[16,128], index: 3, kind: output, shape index: {}]  }
   0x1   :  { %160 = vmatprep.subr.bf16.mxu0 %v191_v0  ;;  %v182_v1 = vld [vmem:[%s249_s1] sm:$0xff]   ;;  %176 = vmatprep.mubr.msk.bf16.mxu0 %vm192_vm0, %v191_v0  ;;  %v183_v2 = vld [vmem:[%s249_s1 + $0x8] sm:$0xff]   ;;  %v184_v3 = vld [vmem:[%s249_s1 + $0x10] sm:$0xff]  }
   0x2   :  { %161 = vmatpush3.bf16.msra.mxu0 %v182_v1  ;;  %v185_v4 = vld [vmem:[%s249_s1 + $0x18] sm:$0xff]   ;;  %v186_v5 = vld [vmem:[%s249_s1 + $0x20] sm:$0xff]   ;;  %v187_v6 = vld [vmem:[%s249_s1 + $0x28] sm:$0xff]  }
   0x3   :  { %162 = vmatprep.subr.bf16.mxu0 %v191_v0  ;;  %v188_v7 = vld [vmem:[%s249_s1 + $0x30] sm:$0xff]   ;;  %v189_v8 = vld [vmem:[%s249_s1 + $0x38] sm:$0xff]   ;;  %v190_v9 = vld [vmem:[%s250_s0] sm:$0xff]  }
   0x4   :  { %v141_v10 = vld [vmem:[%s251_s2] ss:$0 sm:$0xff] }
   0x6   :  { %163 = vmatpush3.bf16.msra.mxu0 %v183_v2 }
   0x7   :  { %164 = vmatprep.subr.bf16.mxu0 %v191_v0 }
   0xa   :  { %165 = vmatpush3.bf16.msra.mxu0 %v184_v3 }
   0xb   :  { %166 = vmatprep.subr.bf16.mxu0 %v191_v0 }
   0xe   :  { %167 = vmatpush3.bf16.msra.mxu0 %v185_v4 }
   0xf   :  { %168 = vmatprep.subr.bf16.mxu0 %v191_v0 }
  0x12   :  { %169 = vmatpush3.bf16.msra.mxu0 %v186_v5 }
  0x13   :  { %170 = vmatprep.subr.bf16.mxu0 %v191_v0 }
  0x16   :  { %171 = vmatpush3.bf16.msra.mxu0 %v187_v6 }
  0x17   :  { %172 = vmatprep.subr.bf16.mxu0 %v191_v0 }
  0x1a   :  { %173 = vmatpush3.bf16.msra.mxu0 %v188_v7 }
  0x1b   :  { %174 = vmatprep.subr.bf16.mxu0 %v191_v0 }
  0x1e   :  { %175 = vmatpush3.bf16.msra.mxu0 %v189_v8 }
  0x21   :  { %177 = vmatmul.mubr.bf16.vlgmr.msra.gmra.mrb[0].mxu0 %v190_v9 }
  0xf4   :  { %v128_v11 = vpop.f32.mrb[0].mxu0 }
  0xf5   :  { %v129_v12 = vadd.f32 %v141_v10, %v128_v11  ;;  %v178_v13 = vpop.f32.mrb[1].mxu0 }
  0xf6   :  { %v131_v14 = vpop.f32.mrb[2].mxu0 }
  0xf7   :  { %135 = vst [vmem:[%s252_s3] sm:$0xff] %v129_v12  ;;  %v132_v15 = vadd.f32 %v141_v10, %v131_v14  ;;  %v179_v16 = vpop.f32.mrb[3].mxu0 }
  0xf9   :  { %136 = vst [vmem:[%s252_s3 + $0x8] sm:$0xff] %v132_v15 }

// kernel: decoder.49
= control target key start
LH: loop header
LB: loop body
LE: loop exit
PB: predicated region body
PF: predicated region fallthrough
CT: control target
= control target key end

     0   :  { %s649_s12 = smov 0   ;;  %s651_s13 = smov 0   ;;  %s718_s0 = inlined_call_operand.vmem [shape: f32[2,2,8,64], index: 0, kind: input, shape index: {}]   ;;  %s719_s1 = inlined_call_operand.vmem [shape: f32[2,2,8,64], index: 1, kind: input, shape index: {}]   ;;  %s720_s2 = inlined_call_operand.vmem [shape: f32[2,2,8,64], index: 2, kind: input, shape index: {}]   ;;  %s721_s3 = inlined_call_operand.vmem [shape: f32[2,2,8,64], index: 3, kind: output, shape index: {}]  }
   0x1   :  { %s653_s14 = smov 0   ;;  %s655_s15 = smov 0  }
   0x2   :  { %s657_s16 = smov 0  }
   0x3 LB: > { %s22_s17 = sadd.s32 1, %s617_s14  ;;  %s25_s18 = sadd.s32 1, %s621_s15  ;;  %s625_s16 = sphi %s657_s16, %s13_s16   ;;  %s621_s15 = sphi %s655_s15, %s725_s15   ;;  %s617_s14 = sphi %s653_s14, %s724_s14   ;;  %s613_s13 = sphi %s651_s13, %s723_s13   ;;  %s609_s12 = sphi %s649_s12, %s722_s12  }
   0x4   : > { %p23_p0 = scmp.ge.s32.totalorder %s22_s17, 2  ;;  %p512_p1 = scmp.ge.s32.totalorder %s625_s16, 1 }
   0x5   : > { %p186_p2 = scmp.lt.s32.totalorder %s625_s16, 5 }
   0x6   : > { %s727_s17 = smov (%p23_p0, %s22_s17), 0  ;;  %s729_s18 = smov (!%p23_p0, %s25_s18), %s621_s15 }
   0x7   : > { %p187_p3 = pnand %p512_p1, %p186_p2  ;;  %p27_p4 = scmp.ge.s32.totalorder %s729_s18, 2 }
   0x8   : > { %p232_p5 = scmp.lt.s32.totalorder (!%p187_p3), %s613_s13, 1  ;;  %p234_p6 = scmp.lt.s32.totalorder (!%p187_p3), %s609_s12, 1  ;;  %v627_v0 = vmov (!%p187_p3), 0.0   ;;  %vm628_vm0 = vmmov (!%p187_p3), 0   ;;  %vm269_vm1 = vcmask (!%p187_p3), 523264   ;;  %v317_v6 = vlaneseq (!%p187_p3) }
   0x9   : > { %s731_s18 = smov (%p27_p4, %s729_s18), 0  ;;  %190 = sbr.rel (%p187_p3) target bundleno = 778 (0x30a), region = 32 }
   0xa   : > { %529 = vmatprep.subr.bf16.mxu0 (!%p187_p3), %v627_v0  ;;  %531 = vmatprep.mubr.msk.bf16.mxu0 (!%p187_p3), %vm628_vm0, %v627_v0  ;;  %v318_v7 = vshrl.u32 (!%p187_p3), %v317_v6, 7  ;;  %v320_v8 = vand.u32 (!%p187_p3), 127, %v317_v6  ;;  %vm323_vm3 = vcmask (!%p187_p3), 64512   ;;  %vm341_vm4 = vcmask (!%p187_p3), 1043456  }
   0xb   : > { %535 = vmatprep.subr.bf16.mxu1 (!%p187_p3), %v627_v0  ;;  %537 = vmatprep.mubr.msk.bf16.mxu1 (!%p187_p3), %vm628_vm0, %v627_v0 }
   0xc   : > { %vm321_vm2 = vcmp.gt.s32.totalorder (!%p187_p3), %v320_v8, %v318_v7 }
  0x10   : > { %s733_s13 = smov (!%p232_p5, %s613_s13), 1  ;;  %s735_s12 = smov (!%p234_p6, %s609_s12), 1 }
  0x11   : > { %s513_s19 = sshll.u32 %s733_s13, 1 }
  0x12   : > { %s237_s20 = sadd.s32 %s513_s19, %s735_s12 }
  0x13   : > { %s679_s21 = sshll.u32 %s237_s20, 3 }
  0x14   : > { %s247_s24 = scalar_lea.vmem %s719_s1, %s679_s21  ;;  %s239_s27 = scalar_lea.vmem %s718_s0, %s679_s21 }
  0x15   : > { %v267_v1 = vld [vmem:[%s247_s24] sm:$0xff]  ;;  %s255_s30 = scalar_lea.vmem %s720_s2, %s679_s21  ;;  %s263_s6 = scalar_lea.vmem %s721_s3, %s679_s21 }
  0x16   : > { %v268_v2 = vpack.c.bf16 %v267_v1, %v267_v1  ;;  %v265_v4 = vld [vmem:[%s239_s27] sm:$0xff] }
  0x17   : > { %v266_v5 = vpack.c.bf16 %v265_v4, %v265_v4  ;;  %v335_v21 = vld [vmem:[%s255_s30] sm:$0xff] }
  0x18   : > { %v274_v3 = vsel %vm269_vm1, %v268_v2, 0  ;;  %v336_v22 = vpack.c.bf16 %v335_v21, %v335_v21 }
  0x19   : > { %530 = vmatpush3.bf16.xpose.msra.mxu0 %v274_v3 }
  0x1a   : > { %v343_v23 = vsel %vm341_vm4, %v336_v22, 0 }
  0x1b   : > { %536 = vmatpush3.bf16.msra.mxu1 %v343_v23 }
  0x20   : > { %532 = vmatmul.mubr.msk.bf16.vlgmr.msra.gmra.mrb[0].mxu0 %vm269_vm1, %v266_v5 }
  0xf3   : > { %v310_v9 = vpop.f32.mrb[0].mxu0 }
  0xf4   : > { %v316_v10 = vmul.f32 0.125, %v310_v9  ;;  %v533_v11 = vpop.f32.mrb[1].mxu0 }
  0xf5   : > { %v313_v12 = vpop.f32.mrb[2].mxu0 }
  0xf6   : > { %v534_v13 = vpop.f32.mrb[3].mxu0  ;;  %v322_v14 = vsel %vm321_vm2, -1e+30, %v316_v10 }
  0xf7   : > { %v324_v15 = vsel %vm323_vm3, %v322_v14, -inf }
  0xf8   : > { %325 = vmax.xlane.f32.xlu0 %v324_v15 }
 0x185   : > { %v326_v16 = vpop.xlane.xlu0 %325 }
 0x186   : > { %v327_v17 = vsub.f32 %v322_v14, %v326_v16 }
 0x188   : > { %v328_v18 = vmul.f32 1.442695, %v327_v17 }
 0x18a   : > { %583 = vpow2.f32 %v328_v18 }
 0x194   : > { %v584_v19 = vpop.eup %583 }
 0x195   : > { %v330_v20 = vsel %vm323_vm3, %v584_v19, 0.0 }
 0x196   : > { %331 = vadd.xlane.f32.xlu0 %v330_v20 }
 0x223   : > { %v332_v24 = vpop.xlane.xlu0 %331 }
 0x224   : > { %585 = vrcp.f32 %v332_v24 }
 0x22e   : > { %v586_v25 = vpop.eup %585 }
 0x22f   : > { %v334_v26 = vmul.f32 %v586_v25, %v584_v19 }
 0x231   : > { %v337_v27 = vpack.c.bf16 %v334_v26, %v334_v26 }
 0x233   : > { %538 = vmatmul.mubr.msk.bf16.vlgmr.msra.gmra.mrb[0].mxu1 %vm323_vm3, %v337_v27 }
 0x306   : > { %v379_v28 = vpop.f32.mrb[0].mxu1 }
 0x307   : > { %385 = vst.msk [vmem:[%s263_s6] sm:$0xff] %vm269_vm1, %v379_v28  ;;  %v539_v29 = vpop.f32.mrb[1].mxu1 }
 0x308   : > { %v382_v30 = vpop.f32.mrb[2].mxu1 }
 0x309   : > { %v540_v31 = vpop.f32.mrb[3].mxu1 }
 0x30a PF: > { %s13_s16 = sadd.s32 1, %s625_s16   ;;  %s722_s12 = smov %s617_s14 }
 0x30b   : > { %p10_p7 = scmp.ge.s32.totalorder %s13_s16, 6   ;;  %s723_s13 = smov %s621_s15 }
 0x30c   : > { %s724_s14 = smov %s727_s17  ;;  %s725_s15 = smov %s731_s18 }
 0x30d   :  { %12 = sbr.rel (!%p10_p7) target bundleno = 3 (0x3), region = 68 }

// kernel: decoder.56
= control target key start
LH: loop header
LB: loop body
LE: loop exit
PB: predicated region body
PF: predicated region fallthrough
CT: control target
= control target key end

     0   :  { %s643_s12 = smov 0   ;;  %s645_s13 = smov 0   ;;  %s712_s0 = inlined_call_operand.vmem [shape: f32[2,2,8,64], index: 0, kind: input, shape index: {}]   ;;  %s713_s1 = inlined_call_operand.vmem [shape: f32[2,2,8,64], index: 1, kind: input, shape index: {}]   ;;  %s714_s2 = inlined_call_operand.vmem [shape: f32[2,2,8,64], index: 2, kind: input, shape index: {}]   ;;  %s715_s3 = inlined_call_operand.vmem [shape: f32[2,2,8,64], index: 3, kind: output, shape index: {}]  }
   0x1   :  { %s647_s14 = smov 0   ;;  %s649_s15 = smov 0  }
   0x2   :  { %s651_s16 = smov 0  }
   0x3 LB: > { %s22_s17 = sadd.s32 1, %s611_s14  ;;  %s25_s18 = sadd.s32 1, %s615_s15  ;;  %s619_s16 = sphi %s651_s16, %s13_s16   ;;  %s615_s15 = sphi %s649_s15, %s719_s15   ;;  %s611_s14 = sphi %s647_s14, %s718_s14   ;;  %s607_s13 = sphi %s645_s13, %s717_s13   ;;  %s603_s12 = sphi %s643_s12, %s716_s12  }
   0x4   : > { %p23_p0 = scmp.ge.s32.totalorder %s22_s17, 2  ;;  %p506_p1 = scmp.ge.s32.totalorder %s619_s16, 1 }
   0x5   : > { %p186_p2 = scmp.lt.s32.totalorder %s619_s16, 5 }
   0x6   : > { %s721_s17 = smov (%p23_p0, %s22_s17), 0  ;;  %s723_s18 = smov (!%p23_p0, %s25_s18), %s615_s15 }
   0x7   : > { %p187_p3 = pnand %p506_p1, %p186_p2  ;;  %p27_p4 = scmp.ge.s32.totalorder %s723_s18, 2 }
   0x8   : > { %p232_p5 = scmp.lt.s32.totalorder (!%p187_p3), %s607_s13, 1  ;;  %p234_p6 = scmp.lt.s32.totalorder (!%p187_p3), %s603_s12, 1  ;;  %v621_v0 = vmov (!%p187_p3), 0.0   ;;  %vm622_vm0 = vmmov (!%p187_p3), 0   ;;  %vm269_vm1 = vcmask (!%p187_p3), 523264   ;;  %vm317_vm2 = vcmask (!%p187_p3), 64512  }
   0x9   : > { %s725_s18 = smov (%p27_p4, %s723_s18), 0  ;;  %190 = sbr.rel (%p187_p3) target bundleno = 777 (0x309), region = 32 }
   0xa   : > { %523 = vmatprep.subr.bf16.mxu0 (!%p187_p3), %v621_v0  ;;  %525 = vmatprep.mubr.msk.bf16.mxu0 (!%p187_p3), %vm622_vm0, %v621_v0  ;;  %vm335_vm3 = vcmask (!%p187_p3), 1043456  }
   0xb   : > { %529 = vmatprep.subr.bf16.mxu1 (!%p187_p3), %v621_v0  ;;  %531 = vmatprep.mubr.msk.bf16.mxu1 (!%p187_p3), %vm622_vm0, %v621_v0 }
  0x10   : > { %s727_s13 = smov (!%p232_p5, %s607_s13), 1  ;;  %s729_s12 = smov (!%p234_p6, %s603_s12), 1 }
  0x11   : > { %s507_s19 = sshll.u32 %s727_s13, 1 }
  0x12   : > { %s237_s20 = sadd.s32 %s507_s19, %s729_s12 }
  0x13   : > { %s673_s21 = sshll.u32 %s237_s20, 3 }
  0x14   : > { %s247_s24 = scalar_lea.vmem %s713_s1, %s673_s21  ;;  %s239_s27 = scalar_lea.vmem %s712_s0, %s673_s21 }
  0x15   : > { %v267_v1 = vld [vmem:[%s247_s24] sm:$0xff]  ;;  %s255_s30 = scalar_lea.vmem %s714_s2, %s673_s21  ;;  %s263_s6 = scalar_lea.vmem %s715_s3, %s673_s21 }
  0x16   : > { %v268_v2 = vpack.c.bf16 %v267_v1, %v267_v1  ;;  %v265_v4 = vld [vmem:[%s239_s27] sm:$0xff] }
  0x17   : > { %v266_v5 = vpack.c.bf16 %v265_v4, %v265_v4  ;;  %v329_v17 = vld [vmem:[%s255_s30] sm:$0xff] }
  0x18   : > { %v274_v3 = vsel %vm269_vm1, %v268_v2, 0  ;;  %v330_v18 = vpack.c.bf16 %v329_v17, %v329_v17 }
  0x19   : > { %524 = vmatpush3.bf16.xpose.msra.mxu0 %v274_v3 }
  0x1a   : > { %v337_v19 = vsel %vm335_vm3, %v330_v18, 0 }
  0x1b   : > { %530 = vmatpush3.bf16.msra.mxu1 %v337_v19 }
  0x20   : > { %526 = vmatmul.mubr.msk.bf16.vlgmr.msra.gmra.mrb[0].mxu0 %vm269_vm1, %v266_v5 }
  0xf3   : > { %v310_v6 = vpop.f32.mrb[0].mxu0 }
  0xf4   : > { %v316_v7 = vmul.f32 0.125, %v310_v6  ;;  %v527_v8 = vpop.f32.mrb[1].mxu0 }
  0xf5   : > { %v313_v9 = vpop.f32.mrb[2].mxu0 }
  0xf6   : > { %v528_v10 = vpop.f32.mrb[3].mxu0  ;;  %v318_v11 = vsel %vm317_vm2, %v316_v7, -inf }
  0xf7   : > { %319 = vmax.xlane.f32.xlu0 %v318_v11 }
 0x184   : > { %v320_v12 = vpop.xlane.xlu0 %319 }
 0x185   : > { %v321_v13 = vsub.f32 %v316_v7, %v320_v12 }
 0x187   : > { %v322_v14 = vmul.f32 1.442695, %v321_v13 }
 0x189   : > { %577 = vpow2.f32 %v322_v14 }
 0x193   : > { %v578_v15 = vpop.eup %577 }
 0x194   : > { %v324_v16 = vsel %vm317_vm2, %v578_v15, 0.0 }
 0x195   : > { %325 = vadd.xlane.f32.xlu0 %v324_v16 }
 0x222   : > { %v326_v20 = vpop.xlane.xlu0 %325 }
 0x223   : > { %579 = vrcp.f32 %v326_v20 }
 0x22d   : > { %v580_v21 = vpop.eup %579 }
 0x22e   : > { %v328_v22 = vmul.f32 %v580_v21, %v578_v15 }
 0x230   : > { %v331_v23 = vpack.c.bf16 %v328_v22, %v328_v22 }
 0x232   : > { %532 = vmatmul.mubr.msk.bf16.vlgmr.msra.gmra.mrb[0].mxu1 %vm317_vm2, %v331_v23 }
 0x305   : > { %v373_v24 = vpop.f32.mrb[0].mxu1 }
 0x306   : > { %379 = vst.msk [vmem:[%s263_s6] sm:$0xff] %vm269_vm1, %v373_v24  ;;  %v533_v25 = vpop.f32.mrb[1].mxu1 }
 0x307   : > { %v376_v26 = vpop.f32.mrb[2].mxu1 }
 0x308   : > { %v534_v27 = vpop.f32.mrb[3].mxu1 }
 0x309 PF: > { %s13_s16 = sadd.s32 1, %s619_s16   ;;  %s716_s12 = smov %s611_s14 }
 0x30a   : > { %p10_p7 = scmp.ge.s32.totalorder %s13_s16, 6   ;;  %s717_s13 = smov %s615_s15 }
 0x30b   : > { %s718_s14 = smov %s721_s17  ;;  %s719_s15 = smov %s725_s18 }
 0x30c   :  { %12 = sbr.rel (!%p10_p7) target bundleno = 3 (0x3), region = 68 }

// kernel: decoder.59
= control target key start
LH: loop header
LB: loop body
LE: loop exit
PB: predicated region body
PF: predicated region fallthrough
CT: control target
= control target key end

     0   :  { %v485_v1 = vmov 0   ;;  %v47_v34 = vlaneseq  ;;  %s627_s1 = inlined_call_operand.vmem [shape: bf16[128,256], index: 1, kind: input, shape index: {}]   ;;  %s628_s0 = inlined_call_operand.vmem [shape: bf16[16,128], index: 0, kind: input, shape index: {}]   ;;  %s629_s3 = inlined_call_operand.vmem [shape: bf16[256,128], index: 3, kind: input, shape index: {}]   ;;  %s630_s2 = inlined_call_operand.vmem [shape: f32[1,256], index: 2, kind: input, shape index: {}]   ;;  %s631_s4 = inlined_call_operand.vmem [shape: f32[1,128], index: 4, kind: input, shape index: {}]   ;;  %s632_s5 = inlined_call_operand.vmem [shape: f32[16,128], index: 5, kind: output, shape index: {}]  }
   0x1   :  { %v444_v0 = vld [vmem:[%s627_s1 + $0x4] ss:$8 sps:$4 sm:$0xff]   ;;  %175 = vmatprep.mubr.bf16.mxu0 %v485_v1  ;;  %v446_v2 = vld [vmem:[%s627_s1] ss:$8 sps:$4 sm:$0xff]   ;;  %v447_v3 = vld [vmem:[%s627_s1 + $0x14] ss:$8 sps:$4 sm:$0xff]  }
   0x2   :  { %143 = vmatprep.subr.bf16.mxu0 %v444_v0  ;;  %v449_v4 = vld [vmem:[%s627_s1 + $0x10] ss:$8 sps:$4 sm:$0xff]   ;;  %v450_v5 = vld [vmem:[%s627_s1 + $0x24] ss:$8 sps:$4 sm:$0xff]   ;;  %v452_v6 = vld [vmem:[%s627_s1 + $0x20] ss:$8 sps:$4 sm:$0xff]  }
   0x3   :  { %144 = vmatpush1.bf16.msra.mxu0 %v446_v2  ;;  %v453_v7 = vld [vmem:[%s627_s1 + $0x34] ss:$8 sps:$4 sm:$0xff]   ;;  %v455_v8 = vld [vmem:[%s627_s1 + $0x30] ss:$8 sps:$4 sm:$0xff]   ;;  %v456_v9 = vld [vmem:[%s627_s1 + $0x44] ss:$8 sps:$4 sm:$0xff]  }
   0x4   :  { %145 = vmatprep.subr.bf16.mxu0 %v447_v3  ;;  %v469_v10 = vld [vmem:[%s629_s3 + $0x40] sm:$0xff]   ;;  %v459_v13 = vld [vmem:[%s627_s1 + $0x54] ss:$8 sps:$4 sm:$0xff]   ;;  %v471_v14 = vld [vmem:[%s629_s3 + $0x48] sm:$0xff]   ;;  %v48_v35 = vshrl.u32 %v47_v34, 7 }
   0x5   :  { %v458_v11 = vld [vmem:[%s627_s1 + $0x40] ss:$8 sps:$4 sm:$0xff]   ;;  %421 = vmatprep.subr.bf16.mxu1 %v469_v10  ;;  %v473_v16 = vld [vmem:[%s629_s3 + $0x50] sm:$0xff]   ;;  %v462_v18 = vld [vmem:[%s627_s1 + $0x64] ss:$8 sps:$4 sm:$0xff]  }
   0x6   :  { %v470_v12 = vld [vmem:[%s629_s3] sm:$0xff]   ;;  %v472_v15 = vld [vmem:[%s629_s3 + $0x8] sm:$0xff]   ;;  %v461_v17 = vld [vmem:[%s627_s1 + $0x50] ss:$8 sps:$4 sm:$0xff]   ;;  %v49_v36 = vsub.s32 0, %v48_v35  ;;  %v53_v38 = vsub.s32 1, %v48_v35 }
   0x7   :  { %146 = vmatpush1.bf16.msra.mxu0 %v449_v4  ;;  %422 = vmatpush3.bf16.msra.mxu1 %v470_v12  ;;  %v474_v19 = vld [vmem:[%s629_s3 + $0x10] sm:$0xff]   ;;  %v475_v20 = vld [vmem:[%s629_s3 + $0x58] sm:$0xff]   ;;  %v464_v21 = vld [vmem:[%s627_s1 + $0x60] ss:$8 sps:$4 sm:$0xff]  }
   0x8   :  { %147 = vmatprep.subr.bf16.mxu0 %v450_v5  ;;  %423 = vmatprep.subr.bf16.mxu1 %v471_v14  ;;  %v465_v22 = vld [vmem:[%s627_s1 + $0x74] ss:$8 sps:$4 sm:$0xff]   ;;  %v477_v24 = vld [vmem:[%s629_s3 + $0x60] sm:$0xff]   ;;  %v467_v25 = vld [vmem:[%s627_s1 + $0x70] ss:$8 sps:$4 sm:$0xff]  }
   0x9   :  { %v476_v23 = vld [vmem:[%s629_s3 + $0x18] sm:$0xff]   ;;  %v478_v26 = vld [vmem:[%s629_s3 + $0x20] sm:$0xff]   ;;  %v479_v27 = vld [vmem:[%s629_s3 + $0x68] sm:$0xff]  }
   0xa   :  { %v468_v28 = vld [vmem:[%s628_s0] sm:$0xff]   ;;  %v480_v29 = vld [vmem:[%s629_s3 + $0x28] sm:$0xff]   ;;  %v481_v30 = vld [vmem:[%s629_s3 + $0x70] sm:$0xff]  }
   0xb   :  { %148 = vmatpush1.bf16.msra.mxu0 %v452_v6  ;;  %424 = vmatpush3.bf16.msra.mxu1 %v472_v15  ;;  %v482_v31 = vld [vmem:[%s629_s3 + $0x30] sm:$0xff]   ;;  %v483_v32 = vld [vmem:[%s629_s3 + $0x78] sm:$0xff]   ;;  %v45_v37 = vld [vmem:[%s630_s2] sm:$0x3] }
   0xc   :  { %149 = vmatprep.subr.bf16.mxu0 %v453_v7  ;;  %425 = vmatprep.subr.bf16.mxu1 %v473_v16  ;;  %v484_v33 = vld [vmem:[%s629_s3 + $0x38] sm:$0xff]   ;;  %v50_v39 = vrot.slane %v45_v37, %v49_v36  ;;  %v54_v40 = vrot.slane %v45_v37, %v53_v38  ;;  %v420_v57 = vld [vmem:[%s631_s4] ss:$0 sm:$0xff] }
   0xf   :  { %150 = vmatpush1.bf16.msra.mxu0 %v455_v8  ;;  %426 = vmatpush3.bf16.msra.mxu1 %v474_v19 }
  0x10   :  { %151 = vmatprep.subr.bf16.mxu0 %v456_v9  ;;  %427 = vmatprep.subr.bf16.mxu1 %v475_v20 }
  0x13   :  { %152 = vmatpush1.bf16.msra.mxu0 %v458_v11  ;;  %428 = vmatpush3.bf16.msra.mxu1 %v476_v23 }
  0x14   :  { %153 = vmatprep.subr.bf16.mxu0 %v459_v13  ;;  %429 = vmatprep.subr.bf16.mxu1 %v477_v24 }
  0x17   :  { %154 = vmatpush1.bf16.msra.mxu0 %v461_v17  ;;  %430 = vmatpush3.bf16.msra.mxu1 %v478_v26 }
  0x18   :  { %155 = vmatprep.subr.bf16.mxu0 %v462_v18  ;;  %431 = vmatprep.subr.bf16.mxu1 %v479_v27 }
  0x1b   :  { %156 = vmatpush1.bf16.msra.mxu0 %v464_v21  ;;  %432 = vmatpush3.bf16.msra.mxu1 %v480_v29 }
  0x1c   :  { %157 = vmatprep.subr.bf16.mxu0 %v465_v22  ;;  %433 = vmatprep.subr.bf16.mxu1 %v481_v30 }
  0x1f   :  { %158 = vmatpush1.bf16.msra.mxu0 %v467_v25  ;;  %434 = vmatpush3.bf16.msra.mxu1 %v482_v31 }
  0x20   :  { %435 = vmatprep.subr.bf16.mxu1 %v483_v32 }
  0x22   :  { %176 = vmatmul.mubr.bf16.vlgmr.msra.gmra.mrb[0].mxu0 %v468_v28 }
  0x23   :  { %436 = vmatpush3.bf16.msra.mxu1 %v484_v33 }
  0xf5   :  { %v177_v41 = vpop.f32.mrb[0].mxu0 }
  0xf6   :  { %v178_v42 = vadd.f32 %v177_v41, %v50_v39  ;;  %v179_v43 = vpop.f32.mrb[1].mxu0 }
  0xf7   :  { %v180_v44 = vadd.f32 %v179_v43, %v54_v40  ;;  %v181_v45 = vpop.f32.mrb[2].mxu0 }
  0xf8   :  { %v182_v46 = vadd.f32 %v181_v45, %v50_v39  ;;  %v183_v47 = vpop.f32.mrb[3].mxu0  ;;  %v186_v49 = vmax.f32 %v178_v42, 0.0 }
  0xf9   :  { %v184_v48 = vadd.f32 %v183_v47, %v54_v40  ;;  %v187_v51 = vmax.f32 %v180_v44, 0.0 }
  0xfa   :  { %v188_v50 = vmax.f32 %v182_v46, 0.0 }
  0xfb   :  { %v189_v52 = vmax.f32 %v184_v48, 0.0 }
  0xfc   :  { %v192_v53 = vpack.c.bf16 %v188_v50, %v186_v49 }
  0xfd   :  { %v193_v54 = vpack.c.bf16 %v189_v52, %v187_v51 }
  0xff   :  { %354 = vmatprep.mubr.bf16.mxu1 %v193_v54 }
 0x100   :  { %355 = vmatmul.mubr.bf16.vlgmr.msra.gmra.mrb[0].mxu1 %v192_v53 }
 0x1d3   :  { %v437_v55 = vpop.f32.mrb[0].mxu1 }
 0x1d4   :  { %v438_v56 = vpop.f32.mrb[1].mxu1 }
 0x1d5   :  { %v439_v58 = vadd.f32 %v438_v56, %v437_v55  ;;  %v440_v59 = vpop.f32.mrb[2].mxu1 }
 0x1d6   :  { %v441_v60 = vpop.f32.mrb[3].mxu1 }
 0x1d7   :  { %v379_v61 = vadd.f32 %v439_v58, %v420_v57  ;;  %v442_v62 = vadd.f32 %v441_v60, %v440_v59 }
 0x1d9   :  { %381 = vst [vmem:[%s632_s5] sm:$0xff] %v379_v61  ;;  %v380_v63 = vadd.f32 %v442_v62, %v420_v57 }
 0x1db   :  { %382 = vst [vmem:[%s632_s5 + $0x8] sm:$0xff] %v380_v63 }

</bundles_post_ra>
